<compile_context>
chip_gen: v5e
topology: v5e:2x2
jax: 0.10.0
libtpu: 0.0.40
codegen_flags: <defaults>
</compile_context>

<pallas_src>
import jax
import jax.numpy as jnp
from jax import lax
from jax.experimental import pallas as pl
from jax.experimental.pallas import tpu as pltpu

WINDOW = 11
PAD = WINDOW // 2
WIN_VOL = float(WINDOW ** 3)      # fixed window volume, no boundary correction (as in PyTorch module)
INV_WIN_VOL = 1.0 / WIN_VOL
STAB = 1.0e-4                     # num_stab_const


def _band_matrix(n, pad, dtype=jnp.float32):
    """B[i, j] = 1 if |i - j| <= pad else 0  (1-D box-sum with zero padding)."""
    idx = jnp.arange(n)
    return (jnp.abs(idx[:, None] - idx[None, :]) <= pad).astype(dtype)


def _pick_block_batch(n, d, hw, itemsize=4):
    """Pick NB (batch elements per grid step).

    Priorities: (a) keep >= 2 grid steps when N >= 2 (v7x megacore sharding),
    (b) otherwise make NB as large as possible so the fused matmul M = NB*5*D
    fills the MXU, (c) keep the double-buffered I+J input blocks under ~2 MiB,
    (d) NB must divide N.
    """
    cap = max(1, (2 * 1024 * 1024) // (4 * d * hw * itemsize))  # 2 tensors x 2 buffers
    nb = min(n if n < 2 else n // 2, cap)
    nb = max(nb, 1)
    while n % nb:
        nb -= 1
    return nb


def _ncc_kernel(i_ref, j_ref, l_ref, bd_ref, out_ref):
    nb, d, hw = i_ref.shape                              # static block shape
    I = i_ref[...].reshape(nb * d, hw)                   # (NB*D, HW) lane-dense f32
    J = j_ref[...].reshape(nb * d, hw)

    # Five statistics stacked along the sublane axis -> one wide lane-side MXU matmul.
    flat = jnp.concatenate([I, J, I * I, J * J, I * J], axis=0)        # (5*NB*D, HW)

    # Box over H and W (lane axis): kron(Bh, Bw) is symmetric, f32-exact 0/1 entries.
    # f32 operands -> accurate multi-pass MXU accumulation.
    # TODO(synk): optionally cast operands to bf16 (f32 accumulate) after validating
    # the I^2/J^2 box sums against the target data range.
    t = jnp.dot(flat, l_ref[...], preferred_element_type=jnp.float32)  # (5*NB*D, HW)

    # Box over D (sublane axis): batched dot_general of the (D, D) band against the
    # 5*NB slabs — no block-diagonal zero-fill, no quadratic growth with NB.
    t3 = t.reshape(5 * nb, d, hw)
    s3 = lax.dot_general(
        bd_ref[...], t3,
        dimension_numbers=(((2,), (1,)), ((0,), (0,))),
        preferred_element_type=jnp.float32)                            # (5*NB, D, HW)

    i_sum = s3[0 * nb:1 * nb]
    j_sum = s3[1 * nb:2 * nb]
    i2_sum = s3[2 * nb:3 * nb]
    j2_sum = s3[3 * nb:4 * nb]
    ij_sum = s3[4 * nb:5 * nb]

    cross = jnp.maximum(ij_sum - i_sum * j_sum * INV_WIN_VOL, STAB)
    i_var = jnp.maximum(i2_sum - i_sum * i_sum * INV_WIN_VOL, STAB)
    j_var = jnp.maximum(j2_sum - j_sum * j_sum * INV_WIN_VOL, STAB)
    cc = cross * lax.rsqrt(i_var * j_var)          # EUP rsqrt; no sqrt + divide on VALU

    # Lane-dense per-step partial: reduce only the D sublanes; mean done in wrapper.
    out_ref[...] = jnp.sum(cc, axis=1)             # (NB, HW)


def ncc_loss_pallas(I, J):
    """I, J: [N, 1, D, H, W] float32 (NCDHW). Returns scalar loss -mean(cc) + 1."""
    N, C, D, H, W = I.shape
    assert C == 1
    dt = jnp.float32
    HW = H * W

    # Natural memory order — a free reshape, no relayout kernel.
    I_r = I.astype(dt).reshape(N, D, HW)
    J_r = J.astype(dt).reshape(N, D, HW)

    NB = _pick_block_batch(N, D, HW)
    NG = N // NB

    Bd = _band_matrix(D, PAD, dt)                        # (D, D)   box over depth (sublane side)
    L = jnp.kron(_band_matrix(H, PAD, dt),
                 _band_matrix(W, PAD, dt))               # (HW, HW) box over H and W (lane side)
    Bd_b = jnp.broadcast_to(Bd, (5 * NB, D, D))          # batched band, grid-invariant (DMA'd once)

    # Advisory cost estimate for XLA's scheduler.
    flops = int(2 * N * 5 * D * HW * HW            # lane-side box matmul
                + 2 * N * 5 * D * D * HW           # sublane-side (D) batched box matmul
                + 20 * N * D * HW)                 # elementwise stats
    transcendentals = int(N * D * HW)              # rsqrt
    bytes_accessed = int(4 * (2 * N * D * HW + HW * HW + 5 * NB * D * D + N * HW))

    partials = pl.pallas_call(
        _ncc_kernel,
        out_shape=jax.ShapeDtypeStruct((NG, NB, HW), dt),
        grid_spec=pltpu.PrefetchScalarGridSpec(
            num_scalar_prefetch=0,
            grid=(NG,),
            in_specs=[
                pl.BlockSpec((NB, D, HW), lambda n: (n, 0, 0)),
                pl.BlockSpec((NB, D, HW), lambda n: (n, 0, 0)),
                pl.BlockSpec((HW, HW), lambda n: (0, 0)),           # grid-invariant
                pl.BlockSpec((5 * NB, D, D), lambda n: (0, 0, 0)),  # grid-invariant
            ],
            out_specs=pl.BlockSpec((None, NB, HW), lambda n: (n, 0, 0)),
        ),
        compiler_params=pltpu.CompilerParams(
            dimension_semantics=("parallel",),     # batch groups shard across TCs on v7x
            vmem_limit_bytes=8 * 1024 * 1024,      # actual footprint ~2 MiB at these shapes
        ),
        cost_estimate=pl.CostEstimate(
            flops=flops, transcendentals=transcendentals, bytes_accessed=bytes_accessed),
    )(I_r, J_r, L, Bd_b)

    return 1.0 - jnp.sum(partials) / jnp.float32(N * D * H * W)


def ncc_loss_ref(I, J):
    """Plain-JAX reference matching the PyTorch forward (for verification)."""
    k = jnp.ones((1, 1, WINDOW, WINDOW, WINDOW), I.dtype)
    dn = lax.conv_dimension_numbers(I.shape, k.shape, ("NCDHW", "OIDHW", "NCDHW"))
    conv = lambda x: lax.conv_general_dilated(
        x, k, (1, 1, 1), [(PAD, PAD)] * 3, dimension_numbers=dn,
        precision=lax.Precision.HIGHEST)
    I_sum, J_sum = conv(I), conv(J)
    I2_sum, J2_sum, IJ_sum = conv(I * I), conv(J * J), conv(I * J)
    cross = jnp.maximum(IJ_sum - I_sum * J_sum / WIN_VOL, STAB)
    I_var = jnp.maximum(I2_sum - I_sum ** 2 / WIN_VOL, STAB)
    J_var = jnp.maximum(J2_sum - J_sum ** 2 / WIN_VOL, STAB)
    cc = cross / jnp.sqrt(I_var * J_var)
    return -jnp.mean(cc) + 1.0


if __name__ == "__main__":
    key = jax.random.PRNGKey(0)
    k1, k2 = jax.random.split(key)
    N, C, D, H, W = 4, 1, 16, 16, 16        # NB=2 per step, grid=(2,) -> exercises batch folding
    I = jax.random.normal(k1, (N, C, D, H, W), dtype=jnp.float32)
    J = jax.random.normal(k2, (N, C, D, H, W), dtype=jnp.float32)

    loss = jax.block_until_ready(ncc_loss_pallas(I, J))
    ref = jax.block_until_ready(ncc_loss_ref(I, J))

    assert jnp.isfinite(loss)
    assert jnp.allclose(loss, ref, rtol=1e-4, atol=1e-4), (loss, ref)
    print("KERNEL_OK")
</pallas_src>

<mosaic_0001>
module attributes {stable_mosaic.version = 11 : i64} {
  func.func @_ncc_kernel(%arg0: i32, %arg1: memref<2x16x256xf32, #tpu.memory_space<vmem>>, %arg2: memref<2x16x256xf32, #tpu.memory_space<vmem>>, %arg3: memref<256x256xf32, #tpu.memory_space<vmem>>, %arg4: memref<10x16x16xf32, #tpu.memory_space<vmem>>, %arg5: memref<1x2x256xf32, #tpu.memory_space<vmem>>) attributes {dimension_semantics = [#tpu.dimension_semantics<parallel>], iteration_bounds = array<i64: 2>, scalar_prefetch = 0 : i64, scratch_operands = 0 : i64, tpu.core_type = #tpu.core_type<tc>, window_params = [{transform_indices = @transform_0, window_bounds = array<i64: 2, 16, 256>}, {transform_indices = @transform_1, window_bounds = array<i64: 2, 16, 256>}, {pipeline_mode = #tpu.pipeline_mode<synchronous>, transform_indices = @transform_2, window_bounds = array<i64: 256, 256>}, {pipeline_mode = #tpu.pipeline_mode<synchronous>, transform_indices = @transform_3, window_bounds = array<i64: 10, 16, 16>}, {transform_indices = @transform_4, window_bounds = array<i64: 1, 2, 256>}]} {
    %c0 = arith.constant 0 : index
    %c0_0 = arith.constant 0 : index
    %c0_1 = arith.constant 0 : index
    %0 = vector.load %arg1[%c0, %c0_0, %c0_1] : memref<2x16x256xf32, #tpu.memory_space<vmem>>, vector<2x16x256xf32>
    %1 = vector.shape_cast %0 : vector<2x16x256xf32> to vector<32x256xf32>
    %c0_2 = arith.constant 0 : index
    %c0_3 = arith.constant 0 : index
    %c0_4 = arith.constant 0 : index
    %2 = vector.load %arg2[%c0_2, %c0_3, %c0_4] : memref<2x16x256xf32, #tpu.memory_space<vmem>>, vector<2x16x256xf32>
    %3 = vector.shape_cast %2 : vector<2x16x256xf32> to vector<32x256xf32>
    %4 = arith.mulf %1, %1 : vector<32x256xf32>
    %5 = arith.mulf %3, %3 : vector<32x256xf32>
    %6 = arith.mulf %1, %3 : vector<32x256xf32>
    %7 = tpu.concatenate %1, %3, %4, %5, %6 in 0 : vector<32x256xf32>, vector<32x256xf32>, vector<32x256xf32>, vector<32x256xf32>, vector<32x256xf32> -> vector<160x256xf32>
    %c0_5 = arith.constant 0 : index
    %c0_6 = arith.constant 0 : index
    %8 = vector.load %arg3[%c0_5, %c0_6] : memref<256x256xf32, #tpu.memory_space<vmem>>, vector<256x256xf32>
    %cst = arith.constant dense<0.000000e+00> : vector<160x256xf32>
    %9 = tpu.matmul %7, %8, %cst {dimension_numbers = #tpu.dot_dimension_numbers<[1], [0], [0], [1], [0, 0, 1, 1], [], []>} : vector<160x256xf32>, vector<256x256xf32>, vector<160x256xf32> -> vector<160x256xf32>
    %10 = vector.shape_cast %9 : vector<160x256xf32> to vector<10x16x256xf32>
    %c0_7 = arith.constant 0 : index
    %c0_8 = arith.constant 0 : index
    %c0_9 = arith.constant 0 : index
    %11 = vector.load %arg4[%c0_7, %c0_8, %c0_9] : memref<10x16x16xf32, #tpu.memory_space<vmem>>, vector<10x16x16xf32>
    %cst_10 = arith.constant dense<0.000000e+00> : vector<10x16x256xf32>
    %12 = tpu.matmul %11, %10, %cst_10 {dimension_numbers = #tpu.dot_dimension_numbers<[2], [1], [1], [2], [0, 0, 0, 1, 1, 2], [0], [0]>} : vector<10x16x16xf32>, vector<10x16x256xf32>, vector<10x16x256xf32> -> vector<10x16x256xf32>
    %13 = vector.extract_strided_slice %12 {offsets = [0, 0, 0], sizes = [2, 16, 256], strides = [1, 1, 1]} : vector<10x16x256xf32> to vector<2x16x256xf32>
    %14 = vector.extract_strided_slice %12 {offsets = [2, 0, 0], sizes = [2, 16, 256], strides = [1, 1, 1]} : vector<10x16x256xf32> to vector<2x16x256xf32>
    %15 = vector.extract_strided_slice %12 {offsets = [4, 0, 0], sizes = [2, 16, 256], strides = [1, 1, 1]} : vector<10x16x256xf32> to vector<2x16x256xf32>
    %16 = vector.extract_strided_slice %12 {offsets = [6, 0, 0], sizes = [2, 16, 256], strides = [1, 1, 1]} : vector<10x16x256xf32> to vector<2x16x256xf32>
    %17 = vector.extract_strided_slice %12 {offsets = [8, 0, 0], sizes = [2, 16, 256], strides = [1, 1, 1]} : vector<10x16x256xf32> to vector<2x16x256xf32>
    %18 = arith.mulf %13, %14 : vector<2x16x256xf32>
    %cst_11 = arith.constant 7.51314801E-4 : f32
    %19 = vector.broadcast %cst_11 : f32 to vector<2x16x256xf32>
    %20 = arith.mulf %18, %19 : vector<2x16x256xf32>
    %21 = arith.subf %17, %20 : vector<2x16x256xf32>
    %cst_12 = arith.constant 9.99999974E-5 : f32
    %22 = vector.broadcast %cst_12 : f32 to vector<2x16x256xf32>
    %23 = arith.maximumf %21, %22 : vector<2x16x256xf32>
    %24 = arith.mulf %13, %13 : vector<2x16x256xf32>
    %cst_13 = arith.constant 7.51314801E-4 : f32
    %25 = vector.broadcast %cst_13 : f32 to vector<2x16x256xf32>
    %26 = arith.mulf %24, %25 : vector<2x16x256xf32>
    %27 = arith.subf %15, %26 : vector<2x16x256xf32>
    %cst_14 = arith.constant 9.99999974E-5 : f32
    %28 = vector.broadcast %cst_14 : f32 to vector<2x16x256xf32>
    %29 = arith.maximumf %27, %28 : vector<2x16x256xf32>
    %30 = arith.mulf %14, %14 : vector<2x16x256xf32>
    %cst_15 = arith.constant 7.51314801E-4 : f32
    %31 = vector.broadcast %cst_15 : f32 to vector<2x16x256xf32>
    %32 = arith.mulf %30, %31 : vector<2x16x256xf32>
    %33 = arith.subf %16, %32 : vector<2x16x256xf32>
    %cst_16 = arith.constant 9.99999974E-5 : f32
    %34 = vector.broadcast %cst_16 : f32 to vector<2x16x256xf32>
    %35 = arith.maximumf %33, %34 : vector<2x16x256xf32>
    %36 = arith.mulf %29, %35 : vector<2x16x256xf32>
    %37 = math.rsqrt %36 : vector<2x16x256xf32>
    %38 = arith.mulf %23, %37 : vector<2x16x256xf32>
    %cst_17 = arith.constant dense<0.000000e+00> : vector<2x256xf32>
    %39 = vector.multi_reduction <add>, %38, %cst_17 [1] : vector<2x16x256xf32> to vector<2x256xf32>
    %c0_18 = arith.constant 0 : index
    %c0_19 = arith.constant 0 : index
    %c0_20 = arith.constant 0 : index
    %40 = vector.load %arg5[%c0_18, %c0_19, %c0_20] : memref<1x2x256xf32, #tpu.memory_space<vmem>>, vector<1x2x256xf32>
    %41 = vector.shape_cast %40 : vector<1x2x256xf32> to vector<2x256xf32>
    %42 = vector.shape_cast %39 : vector<2x256xf32> to vector<1x2x256xf32>
    tpu.vector_store %arg5[%c0_18, %c0_19, %c0_20], %42 {strides = array<i32>} : memref<1x2x256xf32, #tpu.memory_space<vmem>>, vector<1x2x256xf32>,
    return
  }
  func.func @transform_0(%arg0: i32) -> (i32, i32, i32) {
    %c0_i32 = arith.constant 0 : i32
    %c0_i32_0 = arith.constant 0 : i32
    %c0_i32_1 = arith.constant 0 : i32
    return %arg0, %c0_i32, %c0_i32_0 : i32, i32, i32
  }
  func.func @transform_1(%arg0: i32) -> (i32, i32, i32) {
    %c0_i32 = arith.constant 0 : i32
    %c0_i32_0 = arith.constant 0 : i32
    %c0_i32_1 = arith.constant 0 : i32
    return %arg0, %c0_i32, %c0_i32_0 : i32, i32, i32
  }
  func.func @transform_2(%arg0: i32) -> (i32, i32) {
    %c0_i32 = arith.constant 0 : i32
    %c0_i32_0 = arith.constant 0 : i32
    %c0_i32_1 = arith.constant 0 : i32
    return %c0_i32, %c0_i32_0 : i32, i32
  }
  func.func @transform_3(%arg0: i32) -> (i32, i32, i32) {
    %c0_i32 = arith.constant 0 : i32
    %c0_i32_0 = arith.constant 0 : i32
    %c0_i32_1 = arith.constant 0 : i32
    %c0_i32_2 = arith.constant 0 : i32
    return %c0_i32, %c0_i32_0, %c0_i32_1 : i32, i32, i32
  }
  func.func @transform_4(%arg0: i32) -> (i32, i32, i32) {
    %c0_i32 = arith.constant 0 : i32
    %c0_i32_0 = arith.constant 0 : i32
    %c0_i32_1 = arith.constant 0 : i32
    return %arg0, %c0_i32, %c0_i32_0 : i32, i32, i32
  }
}

</mosaic_0001>

<bundles_post_ra>
// kernel: tpu_custom_call.1
= control target key start
LH: loop header
LB: loop body
LE: loop exit
PB: predicated region body
PF: predicated region fallthrough
CT: control target
= control target key end

     0   :  { %s2573_s0 = inlined_call_operand.hbm [shape: f32[4,16,256], index: 0, kind: input, shape index: {}]   ;;  %s2574_s1 = inlined_call_operand.hbm [shape: f32[4,16,256], index: 1, kind: input, shape index: {}]   ;;  %s2575_s2 = inlined_call_operand.hbm [shape: f32[256,256], index: 2, kind: input, shape index: {}]   ;;  %s2576_s3 = inlined_call_operand.hbm [shape: f32[10,16,16], index: 3, kind: input, shape index: {}]   ;;  %s2577_s4 = inlined_call_operand.hbm [shape: f32[2,2,256], index: 4, kind: output, shape index: {}]  }
   0x1   :  { %2582 = sst [smem:[#allocation16_spill]] %s2573_s0 }
   0x2   :  { %2583 = sst [smem:[#allocation17_spill]] %s2575_s2 }
   0x3   :  { %2584 = sst [smem:[#allocation18_spill]] %s2576_s3 }
   0x4   :  { %9 = vsyncpa [#allocation3], 0 }
   0x5   :  { %11 = vsyncpa [#allocation3 + $0x1], 0 }
   0x6   :  { %12 = vsyncpa [#allocation6], 0 }
   0x7   :  { %14 = vsyncpa [#allocation6 + $0x1], 0 }
   0x8   :  { %15 = vsyncpa [#allocation9], 0 }
   0x9   :  { %16 = vsyncpa [#allocation4], 0 }
   0xa   :  { %18 = vsyncpa [#allocation4 + $0x1], 0  ;;  %s2015_s15 = smov 0   ;;  %s2017_s16 = smov 0  }
   0xb   :  { %s2019_s17 = smov 0   ;;  %s2021_s18 = smov 0  }
   0xc LB: > { %s2036_s19 = sadd.s32 4294967295, %s1982_s18   ;;  %s1623_s20 = sadd.s32 4294967294, %s1982_s18   ;;  %s1982_s18 = sphi %s2021_s18, %s2601_s18   ;;  %s1978_s17 = sphi %s2019_s17, %s2600_s17   ;;  %s1974_s16 = sphi %s2017_s16, %s2599_s16   ;;  %s1970_s15 = sphi %s2015_s15, %s2598_s15  }
   0xd   : > { %p44_p0 = scmp.ne.s32.totalorder %s1974_s16, %s1970_s15  ;;  %p45_p1 = scmp.eq.s32.totalorder %s2036_s19, 0 }
   0xe   : > { %p136_p2 = scmp.eq.s32.totalorder %s2036_s19, 1  ;;  %p142_p3 = scmp.eq.s32.totalorder %s1623_s20, 1 }
   0xf   : > { %p2045_p4 = por %p45_p1, %p44_p0  ;;  %p1624_p5 = scmp.ge.s32.totalorder %s1982_s18, 1 }
  0x10   : > { %p2050_p6 = por %p142_p3, %p44_p0  ;;  %p149_p7 = scmp.lt.s32.totalorder %s1982_s18, 3 }
  0x11   : > { %s2587_s2 = sld [smem:[#allocation17_spill]]  ;;  %s1984_s27 = smov [#allocation7]  }
  0x12   : > { %p2058_p8 = pnand %p1624_p5, %p149_p7  ;;  %s162_s28 = sshll.u32 %s1984_s27, 4  ;;  %s163_s28 = int_to_ptr.vmem [resolvable:$true] %s162_s28 }
  0x13   : > { %s2589_s3 = sld [smem:[#allocation18_spill]]  ;;  %s2578_s6 = smov 256  }
  0x14   : > { %p1706_p9 = pneg %p2058_p8  ;;  %s2580_s7 = smov 16  }
  0x15   : > { %s1987_s8 = smov [#allocation8]   ;;  %s1988_s10 = smov 128  }
  0x16   : > { %p1707_p10 = pnand %p1706_p9, %p45_p1  ;;  %s176_s9 = sshll.u32 %s1987_s8, 4  ;;  %s177_s9 = int_to_ptr.vmem [resolvable:$true] %s176_s9 }
  0x17   : > { %s160_s25 = sshll.u32 %s2587_s2, 4  ;;  %s1989_s11 = smov 8   ;;  %s161_s25 = int_to_ptr.hbm [resolvable:$true] %s160_s25 }
  0x18   : > { %1709 = dma.hbm_to_vmem [thread:$0]  (!%p1707_p10), %s161_s25, 8192, %s163_s28, [#allocation6], %s2578_s6, %s2578_s6, %s2580_s7  }
  0x19   : > { %s174_s5 = sshll.u32 %s2589_s3, 4  ;;  %s2074_s12 = sadd.s32 1, %s1982_s18   ;;  %s175_s5 = int_to_ptr.hbm [resolvable:$true] %s174_s5 }
  0x1a   : > { %1712 = dma.hbm_to_vmem [thread:$0]  (!%p1707_p10), %s175_s5, 2560, %s177_s9, [#allocation9], %s1988_s10, %s1988_s10, %s1989_s11  }
  0x1b   : > { %s28_s13 = ssub.s32 %s1982_s18, %s2074_s12  ;;  %s31_s14 = sadd.s32 1, %s1978_s17 }
  0x1c   : > { %p29_p12 = scmp.eq.s32.totalorder %s28_s13, 0  ;;  %p38_p13 = scmp.ne.s32.totalorder %s1978_s17, %s1974_s16 }
  0x1d   : > { %p39_p0 = scmp.eq.s32.totalorder %s1982_s18, 0  ;;  %p1726_p7 = scmp.lt.s32.totalorder %s1982_s18, 2 }
  0x1e   : > { %s2083_s20 = scalar_select %p29_p12, %s1978_s17, %s31_s14  }
  0x1f   : > { %p40_p3 = por %p39_p0, %p38_p13  ;;  %p2087_p5 = por %p136_p2, %p38_p13 }
  0x20   : > { %s190_s24 = sand.u32 1, %s1978_s17   ;;  %s1688_s27 = sshll.u32 %s1982_s18, 6 }
  0x21   : > { %s2093_s25 = sshll.u32 %s190_s24, 6  ;;  %s2591_s0 = sld [smem:[#allocation16_spill]] }
  0x22   : > { %s194_s5 = scalar_lea.vmem [#allocation2], %s2093_s25  ;;  %p2100_p9 = pnand %p1726_p7, %p40_p3 }
  0x23   : > { %s203_s8 = sshll.u32 %s194_s5, 4  ;;  %s223_s14 = scalar_lea.hbm %s2574_s1, %s1688_s27  ;;  %s204_s8 = int_to_ptr.vmem [resolvable:$true] %s203_s8 }
  0x24   : > { %s224_s6 = sshll.u32 %s223_s14, 4  ;;  %s191_s7 = scalar_lea.sflag [#allocation3], %s190_s24  ;;  %s225_s6 = int_to_ptr.hbm [resolvable:$true] %s224_s6 }
  0x25   : > { %p1848_p10 = pneg %p2100_p9 }
  0x27   : > { %s200_s30 = scalar_lea.hbm %s2591_s0, %s1688_s27  ;;  %s1851_s5 = scalar_lea.hbm %s2591_s0, 128 }
  0x28   : > { %s201_s9 = sshll.u32 %s200_s30, 4  ;;  %s202_s9 = int_to_ptr.hbm [resolvable:$true] %s201_s9 }
  0x29   : > { %s1844_s2 = sshra.s32 %s202_s9, 4  ;;  %s1845_s2 = int_to_ptr.hbm [resolvable:$true] %s1844_s2 }
  0x2a   : > { %s1846_s28 = scalar_lea.hbm %s1845_s2, 64  ;;  %p1852_p0 = scmp.lt.s32.totalorder %s1845_s2, %s2591_s0 }
  0x2b   : > { %p1847_p2 = scmp.ne.s32.totalorder %s1845_s2, %s1846_s28  ;;  %p1853_p3 = scmp.lt.s32.totalorder %s1851_s5, %s1846_s28 }
  0x2d   : > { %p1849_p12 = pnand %p1848_p10, %p1847_p2  ;;  %p1854_p7 = por %p1853_p3, %p1852_p0 }
  0x2f   : > { %p1850_p13 = pneg %p1849_p12 }
  0x31   : > { %p1855_p11 = pnand %p1854_p7, %p1850_p13 }
  0x33   : > { %1858 = shalt.err (!%p1855_p11)
}
  0x34   : > { %s2593_s24 = smov 16   ;;  %s2594_s27 = smov 256  }
  0x35   : > { %1716 = dma.hbm_to_vmem [thread:$0]  (!%p2100_p9), %s202_s9, 1024, %s204_s8, %s191_s7, %s2594_s27, %s2594_s27, %s2593_s24  }
  0x36   : > { %s217_s14 = scalar_lea.vmem [#allocation5], %s2093_s25  ;;  %s213_s30 = sand.u32 1, %s1982_s18  }
  0x37   : > { %s226_s29 = sshll.u32 %s217_s14, 4  ;;  %s214_s11 = scalar_lea.sflag [#allocation6], %s213_s30  ;;  %s227_s29 = int_to_ptr.vmem [resolvable:$true] %s226_s29 }
  0x38   : > { %s1874_s2 = sshra.s32 %s225_s6, 4  ;;  %s1881_s0 = scalar_lea.hbm %s2574_s1, 128  ;;  %s1875_s2 = int_to_ptr.hbm [resolvable:$true] %s1874_s2 }
  0x39   : > { %s1876_s28 = scalar_lea.hbm %s1875_s2, 64  ;;  %p1882_p13 = scmp.lt.s32.totalorder %s1875_s2, %s2574_s1 }
  0x3a   : > { %p1877_p2 = scmp.ne.s32.totalorder %s1875_s2, %s1876_s28  ;;  %p1883_p0 = scmp.lt.s32.totalorder %s1881_s0, %s1876_s28 }
  0x3c   : > { %p1879_p11 = pnand %p1877_p2, %p1848_p10  ;;  %p1884_p3 = por %p1883_p0, %p1882_p13 }
  0x3e   : > { %p1880_p12 = pneg %p1879_p11 }
  0x40   : > { %p1885_p7 = pnand %p1884_p3, %p1880_p12 }
  0x42   : > { %1888 = shalt.err (!%p1885_p7)
}
  0x43   : > { %1719 = dma.hbm_to_vmem [thread:$0]  (!%p2100_p9), %s225_s6, 1024, %s227_s29, %s214_s11, %s2594_s27, %s2594_s27, %s2593_s24  }
  0x44   : > { %238 = sbr.rel (%p2058_p8) target bundleno = 577 (0x241), region = 36  ;;  %s2142_s25 = sand.u32 (!%p2058_p8), 1, %s1974_s16  }
  0x45   : > { %s1637_s3 = sshll.u32 (!%p2058_p8), %s2142_s25, 6  ;;  %s241_s0 = scalar_lea.sflag (!%p2058_p8), [#allocation3], %s2142_s25 }
  0x46   : > { %s2146_s8 = scalar_lea.vmem (!%p2058_p8), [#allocation2], %s1637_s3 }
  0x49   : > { %1949 = dma.done.wait (%p2045_p4), %s241_s0, 1024  }
  0x4a   : > { %1951 = vsyncadd (%p2045_p4), %s241_s0, 4294966272  ;;  %s250_s6 = sand.u32 1, %s2036_s19   ;;  %s2153_s9 = scalar_lea.vmem [#allocation5], %s1637_s3 }
  0x4b   : > { %s251_s26 = scalar_lea.sflag [#allocation6], %s250_s6 }
  0x4c   : > { %1953 = dma.done.wait (%p2045_p4), %s251_s26, 1024  }
  0x4d   : > { %1955 = vsyncadd (%p2045_p4), %s251_s26, 4294966272 }
  0x4e   : > { %1957 = dma.done.wait (%p45_p1), [#allocation6], 8192  }
  0x4f   : > { %1959 = vsyncadd (%p45_p1), [#allocation6], 4294959104 }
  0x50   : > { %1961 = dma.done.wait (%p45_p1), [#allocation9], 2560  }
  0x51   : > { %1963 = vsyncadd (%p45_p1), [#allocation9], 4294964736  ;;  %v367_v0 = vld [vmem:[#allocation7 + $0xf0] sm:$0xff]  ;;  %v368_v2 = vld [vmem:[#allocation7 + $0xf8] sm:$0xff]  ;;  %vm729_vm0 = vcmask 130048   ;;  %s1641_s21 = sshll.u32 %s2142_s25, 2 }
  0x52   : > { %v399_v1 = vld [vmem:[#allocation7 + $0x1f0] sm:$0xff]  ;;  %401 = vmatpush.msra.mxu0 %v367_v0  ;;  %v400_v3 = vld [vmem:[#allocation7 + $0x1f8] sm:$0xff]  ;;  %v365_v4 = vld [vmem:[#allocation7 + $0xe0] sm:$0xff]  ;;  %555 = vmatpush.msra.mxu2 %v368_v2  ;;  %s1691_s10 = sshll.u32 %s2036_s19, 2  ;;  %s294_s29 = scalar_lea.vmem [#allocation10], %s1641_s21 }
  0x53   : > { %478 = vmatpush.msra.mxu1 %v399_v1  ;;  %v397_v5 = vld [vmem:[#allocation7 + $0x1e0] sm:$0xff]  ;;  %632 = vmatpush.msra.mxu3 %v400_v3  ;;  %v366_v6 = vld [vmem:[#allocation7 + $0xe8] sm:$0xff]  ;;  %v363_v8 = vld [vmem:[#allocation7 + $0xd0] sm:$0xff]  ;;  %s1506_s14 = scalar_lea.hbm %s2577_s4, %s1691_s10  ;;  %s1508_s30 = sshll.u32 %s294_s29, 4  ;;  %s1509_s30 = int_to_ptr.vmem [resolvable:$true] %s1508_s30 }
  0x54   : > { %v398_v7 = vld [vmem:[#allocation7 + $0x1e8] sm:$0xff]  ;;  %402 = vmatpush.msra.mxu0 %v365_v4  ;;  %v395_v9 = vld [vmem:[#allocation7 + $0x1d0] sm:$0xff]  ;;  %v364_v10 = vld [vmem:[#allocation7 + $0xd8] sm:$0xff]  ;;  %556 = vmatpush.msra.mxu2 %v366_v6  ;;  %s1510_s11 = sshll.u32 %s1506_s14, 4  ;;  %s1495_s19 = scalar_lea.sflag [#allocation4], %s2142_s25  ;;  %s1511_s11 = int_to_ptr.hbm [resolvable:$true] %s1510_s11 }
  0x55   : > { %479 = vmatpush.msra.mxu1 %v397_v5  ;;  %v396_v11 = vld [vmem:[#allocation7 + $0x1d8] sm:$0xff]  ;;  %633 = vmatpush.msra.mxu3 %v398_v7  ;;  %v361_v12 = vld [vmem:[#allocation7 + $0xc0] sm:$0xff]  ;;  %v362_v14 = vld [vmem:[#allocation7 + $0xc8] sm:$0xff]  ;;  %s1918_s2 = sshra.s32 %s1511_s11, 4  ;;  %s1924_s7 = scalar_lea.hbm %s2577_s4, 8  ;;  %s1919_s2 = int_to_ptr.hbm [resolvable:$true] %s1918_s2 }
  0x56   : > { %v393_v13 = vld [vmem:[#allocation7 + $0x1c0] sm:$0xff]  ;;  %403 = vmatpush.msra.mxu0 %v363_v8  ;;  %v394_v15 = vld [vmem:[#allocation7 + $0x1c8] sm:$0xff]  ;;  %557 = vmatpush.msra.mxu2 %v364_v10  ;;  %v359_v16 = vld [vmem:[#allocation7 + $0xb0] sm:$0xff]  ;;  %s1920_s28 = scalar_lea.hbm %s1919_s2, 4  ;;  %p1925_p9 = scmp.lt.s32.totalorder %s1919_s2, %s2577_s4 }
  0x57   : > { %480 = vmatpush.msra.mxu1 %v395_v9  ;;  %634 = vmatpush.msra.mxu3 %v396_v11  ;;  %v391_v17 = vld [vmem:[#allocation7 + $0x1b0] sm:$0xff]  ;;  %v360_v18 = vld [vmem:[#allocation7 + $0xb8] sm:$0xff]  ;;  %v357_v20 = vld [vmem:[#allocation7 + $0xa0] sm:$0xff]  ;;  %p1921_p1 = scmp.ne.s32.totalorder %s1919_s2, %s1920_s28  ;;  %p1926_p10 = scmp.lt.s32.totalorder %s1924_s7, %s1920_s28 }
  0x58   : > { %404 = vmatpush.msra.mxu0 %v361_v12  ;;  %v392_v19 = vld [vmem:[#allocation7 + $0x1b8] sm:$0xff]  ;;  %558 = vmatpush.msra.mxu2 %v362_v14  ;;  %v389_v21 = vld [vmem:[#allocation7 + $0x1a0] sm:$0xff]  ;;  %v358_v22 = vld [vmem:[#allocation7 + $0xa8] sm:$0xff] }
  0x59   : > { %481 = vmatpush.msra.mxu1 %v393_v13  ;;  %635 = vmatpush.msra.mxu3 %v394_v15  ;;  %v390_v23 = vld [vmem:[#allocation7 + $0x1a8] sm:$0xff]  ;;  %v355_v24 = vld [vmem:[#allocation7 + $0x90] sm:$0xff]  ;;  %v356_v26 = vld [vmem:[#allocation7 + $0x98] sm:$0xff]  ;;  %p1922_p4 = pnand %p1921_p1, %p2087_p5  ;;  %p1927_p2 = por %p1926_p10, %p1925_p9 }
  0x5a   : > { %405 = vmatpush.msra.mxu0 %v359_v16  ;;  %559 = vmatpush.msra.mxu2 %v360_v18  ;;  %v387_v25 = vld [vmem:[#allocation7 + $0x190] sm:$0xff]  ;;  %v388_v27 = vld [vmem:[#allocation7 + $0x198] sm:$0xff]  ;;  %v353_v28 = vld [vmem:[#allocation7 + $0x80] sm:$0xff] }
  0x5b   : > { %482 = vmatpush.msra.mxu1 %v391_v17  ;;  %636 = vmatpush.msra.mxu3 %v392_v19  ;;  %v385_v29 = vld [vmem:[#allocation7 + $0x180] sm:$0xff]  ;;  %v354_v30 = vld [vmem:[#allocation7 + $0x88] sm:$0xff]  ;;  %v351_v32 = vld [vmem:[#allocation7 + $0x70] sm:$0xff]  ;;  %p1923_p8 = pneg %p1922_p4 }
  0x5c   : > { %406 = vmatpush.msra.mxu0 %v357_v20  ;;  %560 = vmatpush.msra.mxu2 %v358_v22  ;;  %v386_v31 = vld [vmem:[#allocation7 + $0x188] sm:$0xff]  ;;  %v383_v33 = vld [vmem:[#allocation7 + $0x170] sm:$0xff]  ;;  %v352_v34 = vld [vmem:[#allocation7 + $0x78] sm:$0xff] }
  0x5d   : > { %483 = vmatpush.msra.mxu1 %v389_v21  ;;  %637 = vmatpush.msra.mxu3 %v390_v23  ;;  %v384_v35 = vld [vmem:[#allocation7 + $0x178] sm:$0xff]  ;;  %v349_v36 = vld [vmem:[#allocation7 + $0x60] sm:$0xff]  ;;  %v350_v38 = vld [vmem:[#allocation7 + $0x68] sm:$0xff]  ;;  %p1928_p11 = pnand %p1927_p2, %p1923_p8 }
  0x5e   : > { %407 = vmatpush.msra.mxu0 %v355_v24  ;;  %561 = vmatpush.msra.mxu2 %v356_v26  ;;  %v381_v37 = vld [vmem:[#allocation7 + $0x160] sm:$0xff]  ;;  %v382_v39 = vld [vmem:[#allocation7 + $0x168] sm:$0xff]  ;;  %v347_v40 = vld [vmem:[#allocation7 + $0x50] sm:$0xff] }
  0x5f   : > { %484 = vmatpush.msra.mxu1 %v387_v25  ;;  %638 = vmatpush.msra.mxu3 %v388_v27  ;;  %v379_v41 = vld [vmem:[#allocation7 + $0x150] sm:$0xff]  ;;  %v348_v42 = vld [vmem:[#allocation7 + $0x58] sm:$0xff]  ;;  %v345_v44 = vld [vmem:[#allocation7 + $0x40] sm:$0xff] }
  0x60   : > { %408 = vmatpush.msra.mxu0 %v353_v28  ;;  %562 = vmatpush.msra.mxu2 %v354_v30  ;;  %v380_v43 = vld [vmem:[#allocation7 + $0x158] sm:$0xff]  ;;  %v377_v45 = vld [vmem:[#allocation7 + $0x140] sm:$0xff]  ;;  %v346_v46 = vld [vmem:[#allocation7 + $0x48] sm:$0xff] }
  0x61   : > { %485 = vmatpush.msra.mxu1 %v385_v29  ;;  %639 = vmatpush.msra.mxu3 %v386_v31  ;;  %v378_v47 = vld [vmem:[#allocation7 + $0x148] sm:$0xff]  ;;  %v343_v48 = vld [vmem:[#allocation7 + $0x30] sm:$0xff]  ;;  %v344_v50 = vld [vmem:[#allocation7 + $0x38] sm:$0xff] }
  0x62   : > { %409 = vmatpush.msra.mxu0 %v351_v32  ;;  %563 = vmatpush.msra.mxu2 %v352_v34  ;;  %v375_v49 = vld [vmem:[#allocation7 + $0x130] sm:$0xff]  ;;  %v376_v51 = vld [vmem:[#allocation7 + $0x138] sm:$0xff]  ;;  %v341_v52 = vld [vmem:[#allocation7 + $0x20] sm:$0xff] }
  0x63   : > { %486 = vmatpush.msra.mxu1 %v383_v33  ;;  %640 = vmatpush.msra.mxu3 %v384_v35  ;;  %v373_v53 = vld [vmem:[#allocation7 + $0x120] sm:$0xff]  ;;  %v342_v54 = vld [vmem:[#allocation7 + $0x28] sm:$0xff]  ;;  %v339_v56 = vld [vmem:[#allocation7 + $0x10] sm:$0xff] }
  0x64   : > { %410 = vmatpush.msra.mxu0 %v349_v36  ;;  %564 = vmatpush.msra.mxu2 %v350_v38  ;;  %v374_v55 = vld [vmem:[#allocation7 + $0x128] sm:$0xff]  ;;  %v371_v57 = vld [vmem:[#allocation7 + $0x110] sm:$0xff]  ;;  %v340_v58 = vld [vmem:[#allocation7 + $0x18] sm:$0xff] }
  0x65   : > { %487 = vmatpush.msra.mxu1 %v381_v37  ;;  %641 = vmatpush.msra.mxu3 %v382_v39  ;;  %v372_v59 = vld [vmem:[#allocation7 + $0x118] sm:$0xff]  ;;  %v337_v60 = vld [vmem:[#allocation7] sm:$0xff]  ;;  %v338_v62 = vld [vmem:[#allocation7 + $0x8] sm:$0xff] }
  0x66   : > { %411 = vmatpush.msra.mxu0 %v347_v40  ;;  %565 = vmatpush.msra.mxu2 %v348_v42  ;;  %v369_v61 = vld [vmem:[#allocation7 + $0x100] sm:$0xff]  ;;  %v370_v63 = vld [vmem:[#allocation7 + $0x108] sm:$0xff]  ;;  %v2178_v2 = vld [vmem:[%s2146_s8 + $0x10] sm:$0xff] }
  0x67   : > { %488 = vmatpush.msra.mxu1 %v379_v41  ;;  %642 = vmatpush.msra.mxu3 %v380_v43  ;;  %v2168_v0 = vld [vmem:[%s2146_s8] sm:$0xff]  ;;  %v2171_v1 = vld [vmem:[%s2146_s8 + $0x8] sm:$0xff]  ;;  %v2181_v3 = vld [vmem:[%s2146_s8 + $0x18] sm:$0xff]  ;;  %v315_v18 = vmul.f32 %v2178_v2, %v2178_v2 }
  0x68   : > { %412 = vmatpush.msra.mxu0 %v345_v44  ;;  %566 = vmatpush.msra.mxu2 %v346_v46  ;;  %v2188_v4 = vld [vmem:[%s2146_s8 + $0x20] sm:$0xff]  ;;  %v2191_v5 = vld [vmem:[%s2146_s8 + $0x28] sm:$0xff]  ;;  %v2198_v6 = vld [vmem:[%s2146_s8 + $0x30] sm:$0xff]  ;;  %v313_v16 = vmul.f32 %v2168_v0, %v2168_v0  ;;  %v314_v17 = vmul.f32 %v2171_v1, %v2171_v1  ;;  %v316_v19 = vmul.f32 %v2181_v3, %v2181_v3 }
  0x69   : > { %489 = vmatpush.msra.mxu1 %v377_v45  ;;  %643 = vmatpush.msra.mxu3 %v378_v47  ;;  %v2201_v7 = vld [vmem:[%s2146_s8 + $0x38] sm:$0xff]  ;;  %v2208_v8 = vld [vmem:[%s2153_s9] sm:$0xff]  ;;  %v2211_v9 = vld [vmem:[%s2153_s9 + $0x8] sm:$0xff]  ;;  %v317_v20 = vmul.f32 %v2188_v4, %v2188_v4  ;;  %v318_v21 = vmul.f32 %v2191_v5, %v2191_v5  ;;  %v319_v22 = vmul.f32 %v2198_v6, %v2198_v6 }
  0x6a   : > { %413 = vmatpush.msra.mxu0 %v343_v48  ;;  %567 = vmatpush.msra.mxu2 %v344_v50  ;;  %v2218_v10 = vld [vmem:[%s2153_s9 + $0x10] sm:$0xff]  ;;  %v2221_v11 = vld [vmem:[%s2153_s9 + $0x18] sm:$0xff]  ;;  %v2228_v12 = vld [vmem:[%s2153_s9 + $0x20] sm:$0xff]  ;;  %v320_v23 = vmul.f32 %v2201_v7, %v2201_v7  ;;  %v321_v24 = vmul.f32 %v2208_v8, %v2208_v8  ;;  %v322_v25 = vmul.f32 %v2211_v9, %v2211_v9 }
  0x6b   : > { %490 = vmatpush.msra.mxu1 %v375_v49  ;;  %644 = vmatpush.msra.mxu3 %v376_v51  ;;  %v2231_v13 = vld [vmem:[%s2153_s9 + $0x28] sm:$0xff]  ;;  %v2238_v14 = vld [vmem:[%s2153_s9 + $0x30] sm:$0xff]  ;;  %v2241_v15 = vld [vmem:[%s2153_s9 + $0x38] sm:$0xff]  ;;  %v323_v26 = vmul.f32 %v2218_v10, %v2218_v10  ;;  %v324_v27 = vmul.f32 %v2221_v11, %v2221_v11  ;;  %v325_v28 = vmul.f32 %v2228_v12, %v2228_v12 }
  0x6c   : > { %414 = vmatpush.msra.mxu0 %v341_v52  ;;  %568 = vmatpush.msra.mxu2 %v342_v54  ;;  %v326_v29 = vmul.f32 %v2231_v13, %v2231_v13  ;;  %v327_v30 = vmul.f32 %v2238_v14, %v2238_v14  ;;  %v328_v31 = vmul.f32 %v2241_v15, %v2241_v15 }
  0x6d   : > { %491 = vmatpush.msra.mxu1 %v373_v53  ;;  %645 = vmatpush.msra.mxu3 %v374_v55  ;;  %v329_v32 = vmul.f32 %v2208_v8, %v2168_v0  ;;  %v330_v33 = vmul.f32 %v2211_v9, %v2171_v1  ;;  %v332_v38 = vmul.f32 %v2221_v11, %v2181_v3 }
  0x6e   : > { %415 = vmatpush.msra.mxu0 %v339_v56  ;;  %569 = vmatpush.msra.mxu2 %v340_v58  ;;  %v331_v41 = vmul.f32 %v2218_v10, %v2178_v2  ;;  %v334_v46 = vmul.f32 %v2231_v13, %v2191_v5  ;;  %v333_v50 = vmul.f32 %v2228_v12, %v2188_v4 }
  0x6f   : > { %492 = vmatpush.msra.mxu1 %v371_v57  ;;  %646 = vmatpush.msra.mxu3 %v372_v59  ;;  %v336_v54 = vmul.f32 %v2241_v15, %v2201_v7  ;;  %v335_v57 = vmul.f32 %v2238_v14, %v2198_v6 }
  0x70   : > { %416 = vmatpush.msra.mxu0 %v337_v60  ;;  %570 = vmatpush.msra.mxu2 %v338_v62 }
  0x71   : > { %493 = vmatpush.msra.mxu1 %v369_v61  ;;  %647 = vmatpush.msra.mxu3 %v370_v63 }
  0x72   : > { %417 = vmatmul.f32.vlgmr.msra.gmra.mxu0 %v2168_v0  ;;  %494 = vmatmul.f32.vlgmr.msra.gmra.mxu1 %v2171_v1 }
  0x73   : > { %571 = vmatmul.f32.vlgmr.msra.gmra.mxu2 %v2168_v0  ;;  %648 = vmatmul.f32.vlgmr.msra.gmra.mxu3 %v2171_v1 }
  0x7a   : > { %420 = vmatmul.f32.gmra.mxu0 %v2178_v2  ;;  %497 = vmatmul.f32.gmra.mxu1 %v2181_v3 }
  0x7b   : > { %574 = vmatmul.f32.gmra.mxu2 %v2178_v2  ;;  %651 = vmatmul.f32.gmra.mxu3 %v2181_v3  ;;  %v709_v2 = vld [vmem:[#allocation8] sm:$0xff]  ;;  %v711_v3 = vld [vmem:[#allocation8 + $0x10] sm:$0xff] }
  0x82   : > { %423 = vmatmul.f32.gmra.mxu0 %v2188_v4  ;;  %500 = vmatmul.f32.gmra.mxu1 %v2191_v5 }
  0x83   : > { %577 = vmatmul.f32.gmra.mxu2 %v2188_v4  ;;  %654 = vmatmul.f32.gmra.mxu3 %v2191_v5 }
  0x8a   : > { %426 = vmatmul.f32.gmra.mxu0 %v2198_v6  ;;  %503 = vmatmul.f32.gmra.mxu1 %v2201_v7 }
  0x8b   : > { %580 = vmatmul.f32.gmra.mxu2 %v2198_v6  ;;  %657 = vmatmul.f32.gmra.mxu3 %v2201_v7 }
  0x92   : > { %429 = vmatmul.f32.gmra.mxu0 %v2208_v8  ;;  %506 = vmatmul.f32.gmra.mxu1 %v2211_v9 }
  0x93   : > { %583 = vmatmul.f32.gmra.mxu2 %v2208_v8  ;;  %660 = vmatmul.f32.gmra.mxu3 %v2211_v9  ;;  %v710_v9 = vld [vmem:[#allocation8 + $0x8] sm:$0xff] }
  0x9a   : > { %432 = vmatmul.f32.gmra.mxu0 %v2218_v10  ;;  %509 = vmatmul.f32.gmra.mxu1 %v2221_v11 }
  0x9b   : > { %586 = vmatmul.f32.gmra.mxu2 %v2218_v10  ;;  %663 = vmatmul.f32.gmra.mxu3 %v2221_v11  ;;  %v712_v11 = vld [vmem:[#allocation8 + $0x18] sm:$0xff] }
  0xa2   : > { %435 = vmatmul.f32.gmra.mxu0 %v2228_v12  ;;  %512 = vmatmul.f32.gmra.mxu1 %v2231_v13 }
  0xa3   : > { %589 = vmatmul.f32.gmra.mxu2 %v2228_v12  ;;  %666 = vmatmul.f32.gmra.mxu3 %v2231_v13 }
  0xaa   : > { %438 = vmatmul.f32.gmra.mxu0 %v2238_v14  ;;  %515 = vmatmul.f32.gmra.mxu1 %v2241_v15 }
  0xab   : > { %592 = vmatmul.f32.gmra.mxu2 %v2238_v14  ;;  %669 = vmatmul.f32.gmra.mxu3 %v2241_v15 }
  0xb2   : > { %441 = vmatmul.f32.gmra.mxu0 %v313_v16  ;;  %518 = vmatmul.f32.gmra.mxu1 %v314_v17 }
  0xb3   : > { %595 = vmatmul.f32.gmra.mxu2 %v313_v16  ;;  %672 = vmatmul.f32.gmra.mxu3 %v314_v17 }
  0xba   : > { %444 = vmatmul.f32.gmra.mxu0 %v315_v18  ;;  %521 = vmatmul.f32.gmra.mxu1 %v316_v19 }
  0xbb   : > { %598 = vmatmul.f32.gmra.mxu2 %v315_v18  ;;  %675 = vmatmul.f32.gmra.mxu3 %v316_v19  ;;  %v713_v18 = vld [vmem:[#allocation8 + $0x20] sm:$0xff] }
  0xc2   : > { %447 = vmatmul.f32.gmra.mxu0 %v317_v20  ;;  %524 = vmatmul.f32.gmra.mxu1 %v318_v21 }
  0xc3   : > { %601 = vmatmul.f32.gmra.mxu2 %v317_v20  ;;  %678 = vmatmul.f32.gmra.mxu3 %v318_v21 }
  0xca   : > { %450 = vmatmul.f32.gmra.mxu0 %v319_v22  ;;  %527 = vmatmul.f32.gmra.mxu1 %v320_v23 }
  0xcb   : > { %604 = vmatmul.f32.gmra.mxu2 %v319_v22  ;;  %681 = vmatmul.f32.gmra.mxu3 %v320_v23 }
  0xd2   : > { %453 = vmatmul.f32.gmra.mxu0 %v321_v24  ;;  %530 = vmatmul.f32.gmra.mxu1 %v322_v25 }
  0xd3   : > { %607 = vmatmul.f32.gmra.mxu2 %v321_v24  ;;  %684 = vmatmul.f32.gmra.mxu3 %v322_v25  ;;  %v714_v25 = vld [vmem:[#allocation8 + $0x28] sm:$0xff] }
  0xda   : > { %456 = vmatmul.f32.gmra.mxu0 %v323_v26  ;;  %533 = vmatmul.f32.gmra.mxu1 %v324_v27 }
  0xdb   : > { %610 = vmatmul.f32.gmra.mxu2 %v323_v26  ;;  %687 = vmatmul.f32.gmra.mxu3 %v324_v27  ;;  %v715_v26 = vld [vmem:[#allocation8 + $0x30] sm:$0xff] }
  0xe2   : > { %459 = vmatmul.f32.gmra.mxu0 %v325_v28  ;;  %536 = vmatmul.f32.gmra.mxu1 %v326_v29 }
  0xe3   : > { %613 = vmatmul.f32.gmra.mxu2 %v325_v28  ;;  %690 = vmatmul.f32.gmra.mxu3 %v326_v29 }
  0xea   : > { %462 = vmatmul.f32.gmra.mxu0 %v327_v30  ;;  %539 = vmatmul.f32.gmra.mxu1 %v328_v31 }
  0xeb   : > { %616 = vmatmul.f32.gmra.mxu2 %v327_v30  ;;  %693 = vmatmul.f32.gmra.mxu3 %v328_v31 }
  0xef   : > { %v418_v34 = vpop.f32.mrf.mxu0  ;;  %v495_v35 = vpop.f32.mrf.mxu1 }
  0xf0   : > { %v496_v43 = vadd.f32 %v495_v35, %v418_v34 }
  0xf2   : > { %465 = vmatmul.f32.gmra.mxu0 %v329_v32  ;;  %542 = vmatmul.f32.gmra.mxu1 %v330_v33 }
  0xf3   : > { %619 = vmatmul.f32.gmra.mxu2 %v329_v32  ;;  %696 = vmatmul.f32.gmra.mxu3 %v330_v33  ;;  %v716_v33 = vld [vmem:[#allocation8 + $0x38] sm:$0xff] }
  0xf6   : > { %v572_v36 = vpop.f32.mrf.mxu2  ;;  %v649_v37 = vpop.f32.mrf.mxu3 }
  0xf7   : > { %v421_v39 = vpop.f32.mrf.mxu0  ;;  %v498_v40 = vpop.f32.mrf.mxu1  ;;  %v650_v51 = vadd.f32 %v649_v37, %v572_v36 }
  0xf8   : > { %v499_v42 = vadd.f32 %v498_v40, %v421_v39  ;;  %v717_v40 = vld [vmem:[#allocation8 + $0x40] sm:$0xff] }
  0xfa   : > { %750 = vmatpush.msrb.mxu0 %v499_v42  ;;  %545 = vmatmul.f32.gmra.mxu1 %v332_v38 }
  0xfb   : > { %622 = vmatmul.f32.gmra.mxu2 %v331_v41  ;;  %699 = vmatmul.f32.gmra.mxu3 %v332_v38 }
  0xfc   : > { %751 = vmatpush.msrb.mxu0 %v496_v43 }
  0xfd   : > { %468 = vmatmul.f32.gmra.mxu0 %v331_v41 }
  0xfe   : > { %v575_v44 = vpop.f32.mrf.mxu2  ;;  %v652_v45 = vpop.f32.mrf.mxu3 }
  0xff   : > { %v424_v47 = vpop.f32.mrf.mxu0  ;;  %v501_v48 = vpop.f32.mrf.mxu1  ;;  %v653_v49 = vadd.f32 %v652_v45, %v575_v44 }
 0x100   : > { %v502_v59 = vadd.f32 %v501_v48, %v424_v47  ;;  %v718_v47 = vld [vmem:[#allocation8 + $0x48] sm:$0xff] }
 0x101   : > { %773 = vmatpush.msrb.mxu1 %v653_v49 }
 0x102   : > { %548 = vmatmul.f32.gmra.mxu1 %v334_v46 }
 0x103   : > { %774 = vmatpush.msrb.mxu1 %v650_v51  ;;  %625 = vmatmul.f32.gmra.mxu2 %v333_v50 }
 0x104   : > { %702 = vmatmul.f32.gmra.mxu3 %v334_v46 }
 0x105   : > { %471 = vmatmul.f32.gmra.mxu0 %v333_v50 }
 0x106   : > { %v578_v52 = vpop.f32.mrf.mxu2  ;;  %v655_v53 = vpop.f32.mrf.mxu3 }
 0x107   : > { %v427_v55 = vpop.f32.mrf.mxu0  ;;  %v504_v56 = vpop.f32.mrf.mxu1  ;;  %v656_v1 = vadd.f32 %v655_v53, %v578_v52 }
 0x108   : > { %v505_v58 = vadd.f32 %v504_v56, %v427_v55 }
 0x10a   : > { %802 = vmatpush.msrb.mxu2 %v505_v58  ;;  %551 = vmatmul.f32.gmra.mxu1 %v336_v54 }
 0x10b   : > { %628 = vmatmul.f32.gmra.mxu2 %v335_v57 }
 0x10c   : > { %803 = vmatpush.msrb.mxu2 %v502_v59  ;;  %705 = vmatmul.f32.gmra.mxu3 %v336_v54  ;;  %v719_v54 = vld [vmem:[#allocation8 + $0x50] sm:$0xff] }
 0x10d   : > { %474 = vmatmul.f32.gmra.mxu0 %v335_v57 }
 0x10e   : > { %v581_v60 = vpop.f32.mrf.mxu2  ;;  %v658_v61 = vpop.f32.mrf.mxu3 }
 0x10f   : > { %v659_v62 = vadd.f32 %v658_v61, %v581_v60  ;;  %v430_v63 = vpop.f32.mrf.mxu0  ;;  %v507_v0 = vpop.f32.mrf.mxu1  ;;  %v720_v61 = vld [vmem:[#allocation8 + $0x58] sm:$0xff] }
 0x110   : > { %v508_v10 = vadd.f32 %v507_v0, %v430_v63 }
 0x111   : > { %825 = vmatpush.msrb.mxu3 %v659_v62 }
 0x112   : > { %1644 = vmatmul.msk.f32.vlgmr.msrb.gmra.mxu1 %vm729_vm0, %v709_v2 }
 0x113   : > { %826 = vmatpush.msrb.mxu3 %v656_v1  ;;  %1646 = vmatmul.msk.f32.vlgmr.msrb.gmra.mxu2 %vm729_vm0, %v711_v3 }
 0x114   : > { %1648 = vmatmul.msk.f32.vlgmr.msrb.gmra.mxu3 %vm729_vm0, %v711_v3 }
 0x115   : > { %1642 = vmatmul.msk.f32.vlgmr.msrb.gmra.mxu0 %vm729_vm0, %v709_v2 }
 0x116   : > { %v584_v4 = vpop.f32.mrf.mxu2  ;;  %v661_v5 = vpop.f32.mrf.mxu3 }
 0x117   : > { %v433_v6 = vpop.f32.mrf.mxu0  ;;  %v510_v7 = vpop.f32.mrf.mxu1  ;;  %v662_v17 = vadd.f32 %v661_v5, %v584_v4  ;;  %v721_v4 = vld [vmem:[#allocation8 + $0x60] sm:$0xff] }
 0x118   : > { %v511_v8 = vadd.f32 %v510_v7, %v433_v6 }
 0x11a   : > { %854 = vmatpush.msra.mxu0 %v511_v8  ;;  %1645 = vmatmul.msk.f32.gmra.mxu1 %vm729_vm0, %v710_v9 }
 0x11b   : > { %1647 = vmatmul.msk.f32.gmra.mxu2 %vm729_vm0, %v712_v11 }
 0x11c   : > { %855 = vmatpush.msra.mxu0 %v508_v10  ;;  %1649 = vmatmul.msk.f32.gmra.mxu3 %vm729_vm0, %v712_v11  ;;  %v722_v11 = vld [vmem:[#allocation8 + $0x68] sm:$0xff] }
 0x11d   : > { %1643 = vmatmul.msk.f32.gmra.mxu0 %vm729_vm0, %v710_v9 }
 0x11e   : > { %v587_v12 = vpop.f32.mrf.mxu2  ;;  %v664_v13 = vpop.f32.mrf.mxu3 }
 0x11f   : > { %v665_v14 = vadd.f32 %v664_v13, %v587_v12  ;;  %v436_v15 = vpop.f32.mrf.mxu0  ;;  %v513_v16 = vpop.f32.mrf.mxu1 }
 0x120   : > { %v514_v24 = vadd.f32 %v513_v16, %v436_v15 }
 0x121   : > { %877 = vmatpush.msra.mxu1 %v665_v14 }
 0x123   : > { %878 = vmatpush.msra.mxu1 %v662_v17 }
 0x124   : > { %1652 = vmatmul.msk.f32.vlgmr.msra.gmra.mxu1 %vm729_vm0, %v713_v18 }
 0x125   : > { %1650 = vmatmul.msk.f32.vlgmr.msra.gmra.mxu0 %vm729_vm0, %v713_v18  ;;  %v723_v18 = vld [vmem:[#allocation8 + $0x70] sm:$0xff] }
 0x126   : > { %v590_v19 = vpop.f32.mrf.mxu2  ;;  %v667_v20 = vpop.f32.mrf.mxu3 }
 0x127   : > { %v439_v21 = vpop.f32.mrf.mxu0  ;;  %v516_v22 = vpop.f32.mrf.mxu1  ;;  %v668_v32 = vadd.f32 %v667_v20, %v590_v19 }
 0x128   : > { %v517_v23 = vadd.f32 %v516_v22, %v439_v21 }
 0x12a   : > { %906 = vmatpush.msra.mxu2 %v517_v23 }
 0x12c   : > { %907 = vmatpush.msra.mxu2 %v514_v24  ;;  %1653 = vmatmul.msk.f32.gmra.mxu1 %vm729_vm0, %v714_v25 }
 0x12d   : > { %1654 = vmatmul.msk.f32.vlgmr.msra.gmra.mxu2 %vm729_vm0, %v715_v26  ;;  %1651 = vmatmul.msk.f32.gmra.mxu0 %vm729_vm0, %v714_v25  ;;  %v724_v25 = vld [vmem:[#allocation8 + $0x78] sm:$0xff] }
 0x12e   : > { %v593_v27 = vpop.f32.mrf.mxu2  ;;  %v670_v28 = vpop.f32.mrf.mxu3 }
 0x12f   : > { %v671_v29 = vadd.f32 %v670_v28, %v593_v27  ;;  %v442_v30 = vpop.f32.mrf.mxu0  ;;  %v519_v31 = vpop.f32.mrf.mxu1 }
 0x130   : > { %v520_v39 = vadd.f32 %v519_v31, %v442_v30 }
 0x131   : > { %929 = vmatpush.msra.mxu3 %v671_v29 }
 0x133   : > { %930 = vmatpush.msra.mxu3 %v668_v32  ;;  %v725_v32 = vld [vmem:[#allocation8 + $0x80] sm:$0xff] }
 0x134   : > { %1656 = vmatmul.msk.f32.vlgmr.msra.gmra.mxu3 %vm729_vm0, %v715_v26 }
 0x135   : > { %1655 = vmatmul.msk.f32.gmra.mxu2 %vm729_vm0, %v716_v33 }
 0x136   : > { %v596_v34 = vpop.f32.mrf.mxu2  ;;  %v673_v35 = vpop.f32.mrf.mxu3 }
 0x137   : > { %v445_v36 = vpop.f32.mrf.mxu0  ;;  %v522_v37 = vpop.f32.mrf.mxu1  ;;  %v674_v46 = vadd.f32 %v673_v35, %v596_v34 }
 0x138   : > { %v523_v38 = vadd.f32 %v522_v37, %v445_v36 }
 0x13a   : > { %958 = vmatpush.msrb.mxu0 %v523_v38 }
 0x13c   : > { %1657 = vmatmul.msk.f32.gmra.mxu3 %vm729_vm0, %v716_v33  ;;  %959 = vmatpush.msrb.mxu0 %v520_v39  ;;  %v726_v39 = vld [vmem:[#allocation8 + $0x88] sm:$0xff] }
 0x13d   : > { %1658 = vmatmul.msk.f32.vlgmr.msrb.gmra.mxu0 %vm729_vm0, %v717_v40 }
 0x13e   : > { %v599_v41 = vpop.f32.mrf.mxu2  ;;  %v676_v42 = vpop.f32.mrf.mxu3 }
 0x13f   : > { %v677_v43 = vadd.f32 %v676_v42, %v599_v41  ;;  %v448_v44 = vpop.f32.mrf.mxu0  ;;  %v525_v45 = vpop.f32.mrf.mxu1 }
 0x140   : > { %v526_v53 = vadd.f32 %v525_v45, %v448_v44 }
 0x141   : > { %981 = vmatpush.msrb.mxu1 %v677_v43 }
 0x143   : > { %982 = vmatpush.msrb.mxu1 %v674_v46  ;;  %v727_v46 = vld [vmem:[#allocation8 + $0x90] sm:$0xff] }
 0x144   : > { %1660 = vmatmul.msk.f32.vlgmr.msrb.gmra.mxu1 %vm729_vm0, %v717_v40 }
 0x145   : > { %1659 = vmatmul.msk.f32.gmra.mxu0 %vm729_vm0, %v718_v47 }
 0x146   : > { %v602_v48 = vpop.f32.mrf.mxu2  ;;  %v679_v49 = vpop.f32.mrf.mxu3 }
 0x147   : > { %v451_v50 = vpop.f32.mrf.mxu0  ;;  %v528_v51 = vpop.f32.mrf.mxu1  ;;  %v680_v60 = vadd.f32 %v679_v49, %v602_v48 }
 0x148   : > { %v529_v52 = vadd.f32 %v528_v51, %v451_v50  ;;  %v728_v51 = vld [vmem:[#allocation8 + $0x98] sm:$0xff] }
 0x14a   : > { %1010 = vmatpush.msrb.mxu2 %v529_v52 }
 0x14c   : > { %1011 = vmatpush.msrb.mxu2 %v526_v53  ;;  %1661 = vmatmul.msk.f32.gmra.mxu1 %vm729_vm0, %v718_v47 }
 0x14d   : > { %1662 = vmatmul.msk.f32.vlgmr.msrb.gmra.mxu2 %vm729_vm0, %v719_v54 }
 0x14e   : > { %v605_v55 = vpop.f32.mrf.mxu2  ;;  %v682_v56 = vpop.f32.mrf.mxu3 }
 0x14f   : > { %v683_v57 = vadd.f32 %v682_v56, %v605_v55  ;;  %v454_v58 = vpop.f32.mrf.mxu0  ;;  %v531_v59 = vpop.f32.mrf.mxu1 }
 0x150   : > { %v532_v3 = vadd.f32 %v531_v59, %v454_v58 }
 0x151   : > { %1033 = vmatpush.msrb.mxu3 %v683_v57 }
 0x153   : > { %1034 = vmatpush.msrb.mxu3 %v680_v60 }
 0x154   : > { %1664 = vmatmul.msk.f32.vlgmr.msrb.gmra.mxu3 %vm729_vm0, %v719_v54 }
 0x155   : > { %1663 = vmatmul.msk.f32.gmra.mxu2 %vm729_vm0, %v720_v61 }
 0x156   : > { %v608_v62 = vpop.f32.mrf.mxu2  ;;  %v685_v63 = vpop.f32.mrf.mxu3 }
 0x157   : > { %v457_v0 = vpop.f32.mrf.mxu0  ;;  %v534_v1 = vpop.f32.mrf.mxu1  ;;  %v686_v10 = vadd.f32 %v685_v63, %v608_v62 }
 0x158   : > { %v535_v2 = vadd.f32 %v534_v1, %v457_v0 }
 0x15a   : > { %1062 = vmatpush.msra.mxu0 %v535_v2 }
 0x15c   : > { %1665 = vmatmul.msk.f32.gmra.mxu3 %vm729_vm0, %v720_v61  ;;  %1063 = vmatpush.msra.mxu0 %v532_v3 }
 0x15d   : > { %1666 = vmatmul.msk.f32.vlgmr.msra.gmra.mxu0 %vm729_vm0, %v721_v4 }
 0x15e   : > { %v611_v5 = vpop.f32.mrf.mxu2  ;;  %v688_v6 = vpop.f32.mrf.mxu3 }
 0x15f   : > { %v689_v7 = vadd.f32 %v688_v6, %v611_v5  ;;  %v460_v8 = vpop.f32.mrf.mxu0  ;;  %v537_v9 = vpop.f32.mrf.mxu1 }
 0x160   : > { %v538_v17 = vadd.f32 %v537_v9, %v460_v8 }
 0x161   : > { %1085 = vmatpush.msra.mxu1 %v689_v7 }
 0x163   : > { %1086 = vmatpush.msra.mxu1 %v686_v10 }
 0x164   : > { %1668 = vmatmul.msk.f32.vlgmr.msra.gmra.mxu1 %vm729_vm0, %v721_v4 }
 0x165   : > { %1667 = vmatmul.msk.f32.gmra.mxu0 %vm729_vm0, %v722_v11 }
 0x166   : > { %v614_v12 = vpop.f32.mrf.mxu2  ;;  %v691_v13 = vpop.f32.mrf.mxu3 }
 0x167   : > { %v463_v14 = vpop.f32.mrf.mxu0  ;;  %v540_v15 = vpop.f32.mrf.mxu1  ;;  %v692_v24 = vadd.f32 %v691_v13, %v614_v12 }
 0x168   : > { %v541_v16 = vadd.f32 %v540_v15, %v463_v14 }
 0x16a   : > { %1114 = vmatpush.msra.mxu2 %v541_v16 }
 0x16c   : > { %1115 = vmatpush.msra.mxu2 %v538_v17  ;;  %1669 = vmatmul.msk.f32.gmra.mxu1 %vm729_vm0, %v722_v11 }
 0x16d   : > { %1670 = vmatmul.msk.f32.vlgmr.msra.gmra.mxu2 %vm729_vm0, %v723_v18 }
 0x16e   : > { %v617_v19 = vpop.f32.mrf.mxu2  ;;  %v694_v20 = vpop.f32.mrf.mxu3 }
 0x16f   : > { %v695_v21 = vadd.f32 %v694_v20, %v617_v19  ;;  %v543_v22 = vpop.f32.mrf.mxu1  ;;  %v466_v23 = vpop.f32.mrf.mxu0 }
 0x170   : > { %v544_v31 = vadd.f32 %v543_v22, %v466_v23 }
 0x171   : > { %1137 = vmatpush.msra.mxu3 %v695_v21 }
 0x173   : > { %1138 = vmatpush.msra.mxu3 %v692_v24 }
 0x174   : > { %1672 = vmatmul.msk.f32.vlgmr.msra.gmra.mxu3 %vm729_vm0, %v723_v18 }
 0x175   : > { %1671 = vmatmul.msk.f32.gmra.mxu2 %vm729_vm0, %v724_v25 }
 0x176   : > { %v620_v26 = vpop.f32.mrf.mxu2  ;;  %v697_v27 = vpop.f32.mrf.mxu3 }
 0x177   : > { %v546_v28 = vpop.f32.mrf.mxu1  ;;  %v698_v37 = vadd.f32 %v697_v27, %v620_v26 }
 0x17a   : > { %v469_v29 = vpop.f32.mrf.mxu0 }
 0x17b   : > { %v547_v30 = vadd.f32 %v546_v28, %v469_v29 }
 0x17c   : > { %1673 = vmatmul.msk.f32.gmra.mxu3 %vm729_vm0, %v724_v25 }
 0x17d   : > { %1166 = vmatpush.msrb.mxu0 %v547_v30 }
 0x17e   : > { %v623_v33 = vpop.f32.mrf.mxu2  ;;  %v700_v34 = vpop.f32.mrf.mxu3 }
 0x17f   : > { %v701_v35 = vadd.f32 %v700_v34, %v623_v33  ;;  %v549_v36 = vpop.f32.mrf.mxu1  ;;  %1167 = vmatpush.msrb.mxu0 %v544_v31 }
 0x180   : > { %1674 = vmatmul.msk.f32.vlgmr.msrb.gmra.mxu0 %vm729_vm0, %v725_v32 }
 0x181   : > { %1189 = vmatpush.msrb.mxu1 %v701_v35 }
 0x182   : > { %v472_v38 = vpop.f32.mrf.mxu0 }
 0x183   : > { %1190 = vmatpush.msrb.mxu1 %v698_v37  ;;  %v550_v45 = vadd.f32 %v549_v36, %v472_v38 }
 0x184   : > { %1676 = vmatmul.msk.f32.vlgmr.msrb.gmra.mxu1 %vm729_vm0, %v725_v32 }
 0x186   : > { %v626_v40 = vpop.f32.mrf.mxu2 }
 0x187   : > { %v703_v41 = vpop.f32.mrf.mxu3  ;;  %v552_v42 = vpop.f32.mrf.mxu1 }
 0x188   : > { %1675 = vmatmul.msk.f32.gmra.mxu0 %vm729_vm0, %v726_v39  ;;  %v704_v50 = vadd.f32 %v703_v41, %v626_v40 }
 0x18a   : > { %v475_v43 = vpop.f32.mrf.mxu0 }
 0x18b   : > { %v553_v44 = vadd.f32 %v552_v42, %v475_v43 }
 0x18c   : > { %1677 = vmatmul.msk.f32.gmra.mxu1 %vm729_vm0, %v726_v39 }
 0x18d   : > { %1218 = vmatpush.msrb.mxu2 %v553_v44 }
 0x18e   : > { %v629_v47 = vpop.f32.mrf.mxu2 }
 0x18f   : > { %v706_v48 = vpop.f32.mrf.mxu3  ;;  %1219 = vmatpush.msrb.mxu2 %v550_v45  ;;  %v2337_v53 = vpop.f32.mrf.mxu1 }
 0x190   : > { %v707_v49 = vadd.f32 %v706_v48, %v629_v47  ;;  %1678 = vmatmul.msk.f32.vlgmr.msrb.gmra.mxu2 %vm729_vm0, %v727_v46  ;;  %v1283_v16 = vmul.f32 %v2337_v53, %v2337_v53 }
 0x192   : > { %1241 = vmatpush.msrb.mxu3 %v707_v49  ;;  %v2335_v52 = vpop.f32.mrf.mxu0  ;;  %v1291_v24 = vmul.f32 0.0007513148, %v1283_v16 }
 0x193   : > { %v1282_v6 = vmul.f32 %v2335_v52, %v2335_v52 }
 0x194   : > { %1242 = vmatpush.msrb.mxu3 %v704_v50 }
 0x195   : > { %1680 = vmatmul.msk.f32.vlgmr.msrb.gmra.mxu3 %vm729_vm0, %v727_v46  ;;  %v1290_v11 = vmul.f32 0.0007513148, %v1282_v6 }
 0x196   : > { %v2345_v57 = vpop.f32.mrf.mxu2 }
 0x197   : > { %v2341_v55 = vpop.f32.mrf.mxu1  ;;  %v2351_v60 = vpop.f32.mrf.mxu3 }
 0x198   : > { %1679 = vmatmul.msk.f32.gmra.mxu2 %vm729_vm0, %v728_v51  ;;  %v1285_v23 = vmul.f32 %v2341_v55, %v2341_v55 }
 0x19a   : > { %v2339_v54 = vpop.f32.mrf.mxu0  ;;  %v1293_v33 = vmul.f32 0.0007513148, %v1285_v23 }
 0x19b   : > { %v1284_v9 = vmul.f32 %v2339_v54, %v2339_v54 }
 0x19d   : > { %1681 = vmatmul.msk.f32.gmra.mxu3 %vm729_vm0, %v728_v51  ;;  %v1292_v17 = vmul.f32 0.0007513148, %v1284_v9  ;;  %v1286_v51 = vmul.f32 %v2345_v57, %v2345_v57  ;;  %v1287_v9 = vmul.f32 %v2351_v60, %v2351_v60 }
 0x19e   : > { %v2353_v61 = vpop.f32.mrf.mxu2 }
 0x19f   : > { %v2357_v0 = vpop.f32.mrf.mxu3  ;;  %v1295_v23 = vmul.f32 0.0007513148, %v1287_v9 }
 0x1a1   : > { %v2347_v58 = vpop.f32.mrf.mxu1 }
 0x1a2   : > { %v2343_v56 = vpop.f32.mrf.mxu0  ;;  %v1315_v12 = vmul.f32 %v2347_v58, %v2347_v58 }
 0x1a3   : > { %v1314_v7 = vmul.f32 %v2343_v56, %v2343_v56 }
 0x1a4   : > { %v1323_v19 = vmul.f32 0.0007513148, %v1315_v12 }
 0x1a5   : > { %v1322_v13 = vmul.f32 0.0007513148, %v1314_v7 }
 0x1a9   : > { %v2355_v62 = vpop.f32.mrf.mxu1 }
 0x1aa   : > { %v2349_v59 = vpop.f32.mrf.mxu0  ;;  %v1317_v27 = vmul.f32 %v2355_v62, %v2355_v62 }
 0x1ab   : > { %v1316_v15 = vmul.f32 %v2349_v59, %v2349_v59 }
 0x1ac   : > { %v1325_v38 = vmul.f32 0.0007513148, %v1317_v27 }
 0x1ad   : > { %v1324_v20 = vmul.f32 0.0007513148, %v1316_v15 }
 0x1b0   : > { %v2359_v1 = vpop.f32.mrf.mxu2 }
 0x1b7   : > { %v2361_v4 = vpop.f32.mrf.mxu3 }
 0x1b8   : > { %v2363_v5 = vpop.f32.mrf.mxu2  ;;  %v1319_v16 = vmul.f32 %v2361_v4, %v2361_v4 }
 0x1b9   : > { %v1320_v12 = vmul.f32 %v2363_v5, %v2363_v5 }
 0x1ba   : > { %v961_v63 = vpop.f32.mrf.mxu0 }
 0x1bb   : > { %v1298_v21 = vsub.f32 %v961_v63, %v1290_v11  ;;  %v1318_v63 = vmul.f32 %v2359_v1, %v2359_v1 }
 0x1bd   : > { %v1306_v29 = vmax.f32 %v1298_v21, 0.0001  ;;  %v1326_v11 = vmul.f32 0.0007513148, %v1318_v63 }
 0x1bf   : > { %v2373_v14 = vpop.f32.mrf.mxu3 }
 0x1c1   : > { %v984_v2 = vpop.f32.mrf.mxu1 }
 0x1c2   : > { %v964_v3 = vpop.f32.mrf.mxu0  ;;  %v1299_v35 = vsub.f32 %v984_v2, %v1291_v24  ;;  %v1328_v24 = vmul.f32 0.0007513148, %v1320_v12  ;;  %v1252_v12 = vmul.f32 %v2349_v59, %v2339_v54 }
 0x1c3   : > { %v1300_v25 = vsub.f32 %v964_v3, %v1292_v17  ;;  %v1288_v3 = vmul.f32 %v2353_v61, %v2353_v61 }
 0x1c4   : > { %v1307_v43 = vmax.f32 %v1299_v35, 0.0001 }
 0x1c5   : > { %v1308_v36 = vmax.f32 %v1300_v25, 0.0001  ;;  %v1296_v15 = vmul.f32 0.0007513148, %v1288_v3 }
 0x1c9   : > { %v987_v8 = vpop.f32.mrf.mxu1 }
 0x1ca   : > { %v1301_v41 = vsub.f32 %v987_v8, %v1293_v33 }
 0x1cc   : > { %v1309_v48 = vmax.f32 %v1301_v41, 0.0001 }
 0x1d0   : > { %v2379_v18 = vpop.f32.mrf.mxu2 }
 0x1d7   : > { %v2385_v34 = vpop.f32.mrf.mxu3 }
 0x1d8   : > { %v1016_v42 = vpop.f32.mrf.mxu2 }
 0x1da   : > { %v1065_v10 = vpop.f32.mrf.mxu0 }
 0x1db   : > { %v1330_v22 = vsub.f32 %v1065_v10, %v1322_v13  ;;  %v1294_v10 = vmul.f32 0.0007513148, %v1286_v51  ;;  %v1289_v13 = vmul.f32 %v2357_v0, %v2357_v0 }
 0x1dd   : > { %v1338_v31 = vmax.f32 %v1330_v22, 0.0001  ;;  %v1302_v25 = vsub.f32 %v2379_v18, %v1294_v10  ;;  %v1297_v27 = vmul.f32 0.0007513148, %v1289_v13 }
 0x1df   : > { %v2387_v40 = vmul.f32 %v1338_v31, %v1306_v29  ;;  %v1039_v2 = vpop.f32.mrf.mxu3  ;;  %v1304_v29 = vsub.f32 %v1016_v42, %v1296_v15  ;;  %v1310_v41 = vmax.f32 %v1302_v25, 0.0001 }
 0x1e1   : > { %v1088_v26 = vpop.f32.mrf.mxu1  ;;  %1768 = vrsqrt.f32 %v2387_v40  ;;  %vm1360_vm3 = vweird.f32 %v2387_v40 }
 0x1e2   : > { %v1068_v28 = vpop.f32.mrf.mxu0  ;;  %v1331_v30 = vsub.f32 %v1088_v26, %v1323_v19 }
 0x1e3   : > { %v1332_v32 = vsub.f32 %v1068_v28, %v1324_v20  ;;  %v1327_v28 = vmul.f32 0.0007513148, %v1319_v16 }
 0x1e4   : > { %v1339_v39 = vmax.f32 %v1331_v30, 0.0001 }
 0x1e5   : > { %v1340_v37 = vmax.f32 %v1332_v32, 0.0001 }
 0x1e6   : > { %v2391_v47 = vmul.f32 %v1339_v39, %v1307_v43  ;;  %v1250_v39 = vmul.f32 %v2343_v56, %v2335_v52  ;;  %v1303_v43 = vsub.f32 %v2385_v34, %v1295_v23  ;;  %v1251_v52 = vmul.f32 %v2347_v58, %v2337_v53 }
 0x1e7   : > { %v2389_v45 = vmul.f32 %v1340_v37, %v1308_v36  ;;  %v2405_v7 = vpop.eup %1768  ;;  %v1321_v37 = vmul.f32 %v2373_v14, %v2373_v14  ;;  %v1253_v34 = vmul.f32 %v2355_v62, %v2341_v55 }
 0x1e8   : > { %v1355_v17 = vmul.f32 %v2405_v7, %v2387_v40  ;;  %v1258_v56 = vmul.f32 0.0007513148, %v1250_v39  ;;  %v1311_v13 = vmax.f32 %v1303_v43, 0.0001  ;;  %v1259_v62 = vmul.f32 0.0007513148, %v1251_v52 }
 0x1e9   : > { %v1091_v44 = vpop.f32.mrf.mxu1  ;;  %1770 = vrsqrt.f32 %v2389_v45  ;;  %v1261_v25 = vmul.f32 0.0007513148, %v1253_v34  ;;  %vm1361_vm1 = vweird.f32 %v2405_v7  ;;  %vm1370_vm4 = vweird.f32 %v2391_v47 }
 0x1ea   : > { %v1333_v46 = vsub.f32 %v1091_v44, %v1325_v38  ;;  %1772 = vrsqrt.f32 %v2391_v47  ;;  %v1356_v30 = vmul.f32 %v2405_v7, %v1355_v17  ;;  %v1305_v44 = vsub.f32 %v1039_v2, %v1297_v27  ;;  %vm2470_vm6 = vmor %vm1360_vm3, %vm1361_vm1 }
 0x1eb   : > { %vm1380_vm8 = vweird.f32 %v2389_v45 }
 0x1ec   : > { %v1341_v49 = vmax.f32 %v1333_v46, 0.0001  ;;  %v1312_v46 = vmax.f32 %v1304_v29, 0.0001  ;;  %v1357_v51 = vmul.f32 0.5, %v1356_v30 }
 0x1ed   : > { %v1313_v15 = vmax.f32 %v1305_v44, 0.0001 }
 0x1ee   : > { %v2395_v50 = vmul.f32 %v1341_v49, %v1309_v48  ;;  %v1358_v23 = vsub.f32 1.5, %v1357_v51 }
 0x1ef   : > { %v2407_v8 = vpop.eup %1770 }
 0x1f0   : > { %v1117_v6 = vpop.f32.mrf.mxu2  ;;  %1774 = vrsqrt.f32 %v2395_v50  ;;  %v2419_v19 = vpop.eup %1772  ;;  %v1375_v22 = vmul.f32 %v2407_v8, %v2389_v45  ;;  %v1359_v27 = vmul.f32 %v2405_v7, %v1358_v23  ;;  %vm1381_vm2 = vweird.f32 %v2407_v8 }
 0x1f1   : > { %v1334_v20 = vsub.f32 %v1117_v6, %v1326_v11  ;;  %v1365_v32 = vmul.f32 %v2419_v19, %v2391_v47  ;;  %v1329_v6 = vmul.f32 0.0007513148, %v1321_v37  ;;  %vm1371_vm5 = vweird.f32 %v2419_v19  ;;  %vm1382_vm10 = vmor %vm1380_vm8, %vm1381_vm2 }
 0x1f2   : > { %v1376_v18 = vmul.f32 %v2407_v8, %v1375_v22  ;;  %vm1390_vm7 = vweird.f32 %v2395_v50  ;;  %vm1372_vm11 = vmor %vm1370_vm4, %vm1371_vm5  ;;  %vm1476_vm2 = vcmask 1041408  }
 0x1f3   : > { %v1342_v33 = vmax.f32 %v1334_v20, 0.0001  ;;  %v1366_v48 = vmul.f32 %v2419_v19, %v1365_v32 }
 0x1f4   : > { %v1377_v11 = vmul.f32 0.5, %v1376_v18 }
 0x1f5   : > { %v2438_v49 = vmul.f32 %v1342_v33, %v1310_v41  ;;  %v1367_v17 = vmul.f32 0.5, %v1366_v48 }
 0x1f6   : > { %v2421_v21 = vpop.eup %1774  ;;  %v1378_v58 = vsub.f32 1.5, %v1377_v11 }
 0x1f7   : > { %v1140_v26 = vpop.f32.mrf.mxu3  ;;  %v1385_v35 = vmul.f32 %v2421_v21, %v2395_v50  ;;  %1776 = vrsqrt.f32 %v2438_v49  ;;  %v1368_v59 = vsub.f32 1.5, %v1367_v17  ;;  %vm1391_vm9 = vweird.f32 %v2421_v21 }
 0x1f8   : > { %v1120_v31 = vpop.f32.mrf.mxu2  ;;  %v1335_v38 = vsub.f32 %v1140_v26, %v1327_v28  ;;  %v1260_v26 = vmul.f32 0.0007513148, %v1252_v12  ;;  %vm1392_vm12 = vmor %vm1390_vm7, %vm1391_vm9  ;;  %vm1400_vm13 = vweird.f32 %v2438_v49 }
 0x1f9   : > { %v1336_v36 = vsub.f32 %v1120_v31, %v1328_v24  ;;  %v1386_v63 = vmul.f32 %v2421_v21, %v1385_v35  ;;  %v1379_v31 = vmul.f32 %v2407_v8, %v1378_v58  ;;  %v1255_v58 = vmul.f32 %v2361_v4, %v2351_v60 }
 0x1fa   : > { %v1343_v9 = vmax.f32 %v1335_v38, 0.0001  ;;  %v1369_v38 = vmul.f32 %v2419_v19, %v1368_v59 }
 0x1fb   : > { %v1344_v42 = vmax.f32 %v1336_v36, 0.0001  ;;  %v1387_v20 = vmul.f32 0.5, %v1386_v63  ;;  %v1383_v44 = vsel %vm1382_vm10, %v2407_v8, %v1379_v31  ;;  %v1263_v31 = vmul.f32 0.0007513148, %v1255_v58 }
 0x1fc   : > { %v2450_v24 = vmul.f32 %v1343_v9, %v1311_v13  ;;  %v1373_v8 = vsel %vm1372_vm11, %v2419_v19, %v1369_v38  ;;  %v1254_v19 = vmul.f32 %v2359_v1, %v2345_v57  ;;  %vm1484_vm10 = vcmask 1041409  }
 0x1fd   : > { %v1169_v3 = vpop.f32.mrf.mxu0  ;;  %v2441_v10 = vmul.f32 %v1344_v42, %v1312_v46  ;;  %v1388_v28 = vsub.f32 1.5, %v1387_v20  ;;  %v2460_v32 = vpop.eup %1776  ;;  %v1363_v42 = vsel %vm2470_vm6, %v2405_v7, %v1359_v27  ;;  %vm1486_vm11 = vcmask 1043459  }
 0x1fe   : > { %v1266_v55 = vsub.f32 %v1169_v3, %v1258_v56  ;;  %v1395_v45 = vmul.f32 %v2460_v32, %v2438_v49  ;;  %vm1401_vm14 = vweird.f32 %v2460_v32  ;;  %vm1410_vm6 = vweird.f32 %v2450_v24 }
 0x1ff   : > { %v1143_v2 = vpop.f32.mrf.mxu3  ;;  %1778 = vrsqrt.f32 %v2441_v10  ;;  %v1389_v18 = vmul.f32 %v2421_v21, %v1388_v28  ;;  %vm1402_vm0 = vmor %vm1400_vm13, %vm1401_vm14  ;;  %vm1420_vm1 = vweird.f32 %v2441_v10  ;;  %vm1490_vm13 = vcmask 1047559  }
 0x200   : > { %v1337_v16 = vsub.f32 %v1143_v2, %v1329_v6  ;;  %1780 = vrsqrt.f32 %v2450_v24  ;;  %v1274_v33 = vmax.f32 %v1266_v55, 0.0001  ;;  %v1396_v56 = vmul.f32 %v2460_v32, %v1395_v45 }
 0x201   : > { %v1192_v22 = vpop.f32.mrf.mxu1  ;;  %v1393_v6 = vsel %vm1392_vm12, %v2421_v21, %v1389_v18  ;;  %v1256_v55 = vmul.f32 %v2363_v5, %v2353_v61  ;;  %vm1488_vm12 = vcmask 1045509  }
 0x202   : > { %v1345_v53 = vmax.f32 %v1337_v16, 0.0001  ;;  %v1267_v30 = vsub.f32 %v1192_v22, %v1259_v62  ;;  %v1434_v48 = vmul.f32 %v1363_v42, %v1274_v33  ;;  %v1397_v16 = vmul.f32 0.5, %v1396_v56 }
 0x203   : > { %v1262_v62 = vmul.f32 0.0007513148, %v1254_v19  ;;  %v1257_v33 = vmul.f32 %v2373_v14, %v2357_v0 }
 0x204   : > { %v2453_v54 = vmul.f32 %v1345_v53, %v1313_v15  ;;  %v1275_v41 = vmax.f32 %v1267_v30, 0.0001  ;;  %v1398_v1 = vsub.f32 1.5, %v1397_v16 }
 0x205   : > { %v1172_v29 = vpop.f32.mrf.mxu0  ;;  %v2464_v36 = vpop.eup %1778  ;;  %v1265_v0 = vmul.f32 0.0007513148, %v1257_v33 }
 0x206   : > { %1782 = vrsqrt.f32 %v2453_v54  ;;  %v1268_v35 = vsub.f32 %v1172_v29, %v1260_v26  ;;  %v1415_v46 = vmul.f32 %v2464_v36, %v2441_v10  ;;  %v2493_v63 = vpop.eup %1780  ;;  %v1435_v11 = vmul.f32 %v1373_v8, %v1275_v41 }
 0x207   : > { %v1405_v47 = vmul.f32 %v2493_v63, %v2450_v24  ;;  %v1399_v5 = vmul.f32 %v2460_v32, %v1398_v1  ;;  %vm1421_vm15 = vweird.f32 %v2464_v36  ;;  %vm1411_vm3 = vweird.f32 %v2493_v63 }
 0x208   : > { %v1276_v39 = vmax.f32 %v1268_v35, 0.0001  ;;  %v1416_v34 = vmul.f32 %v2464_v36, %v1415_v46  ;;  %v1264_v35 = vmul.f32 0.0007513148, %v1256_v55  ;;  %vm1422_vm4 = vmor %vm1420_vm1, %vm1421_vm15  ;;  %vm1430_vm8 = vweird.f32 %v2453_v54 }
 0x209   : > { %v1195_v40 = vpop.f32.mrf.mxu1  ;;  %v1406_v15 = vmul.f32 %v2493_v63, %v1405_v47  ;;  %v1403_v46 = vsel %vm1402_vm0, %v2460_v32, %v1399_v5  ;;  %vm1412_vm7 = vmor %vm1410_vm6, %vm1411_vm3 }
 0x20a   : > { %v1269_v43 = vsub.f32 %v1195_v40, %v1261_v25  ;;  %v1436_v51 = vmul.f32 %v1383_v44, %v1276_v39  ;;  %v1417_v17 = vmul.f32 0.5, %v1416_v34 }
 0x20b   : > { %v1407_v57 = vmul.f32 0.5, %v1406_v15 }
 0x20c   : > { %v1277_v3 = vmax.f32 %v1269_v43, 0.0001  ;;  %v2497_v7 = vpop.eup %1782  ;;  %v1442_v9 = vadd.f32 %v1436_v51, %v1434_v48  ;;  %v1418_v59 = vsub.f32 1.5, %v1417_v17 }
 0x20d   : > { %v1425_v50 = vmul.f32 %v2497_v7, %v2453_v54  ;;  %v1408_v4 = vsub.f32 1.5, %v1407_v57  ;;  %vm1431_vm5 = vweird.f32 %v2497_v7 }
 0x20e   : > { %v1437_v52 = vmul.f32 %v1393_v6, %v1277_v3  ;;  %v1443_v2 = vrot.slane %v1442_v9, 4  ;;  %v1419_v38 = vmul.f32 %v2464_v36, %v1418_v59  ;;  %vm1432_vm9 = vmor %vm1430_vm8, %vm1431_vm5 }
 0x20f   : > { %v1426_v23 = vmul.f32 %v2497_v7, %v1425_v50  ;;  %v1409_v45 = vmul.f32 %v2493_v63, %v1408_v4 }
 0x210   : > { %v1449_v12 = vadd.f32 %v1437_v52, %v1435_v11  ;;  %v1444_v13 = vadd.f32 %v1443_v2, %v1442_v9  ;;  %v1423_v48 = vsel %vm1422_vm4, %v2464_v36, %v1419_v38 }
 0x211   : > { %v1427_v27 = vmul.f32 0.5, %v1426_v23  ;;  %v1413_v36 = vsel %vm1412_vm7, %v2493_v63, %v1409_v45 }
 0x212   : > { %v1450_v21 = vrot.slane %v1449_v12, 4  ;;  %v1445_v22 = vrot.slane %v1444_v13, 2 }
 0x213   : > { %v1221_v20 = vpop.f32.mrf.mxu2  ;;  %v1428_v18 = vsub.f32 1.5, %v1427_v27 }
 0x214   : > { %v1451_v53 = vadd.f32 %v1450_v21, %v1449_v12  ;;  %v1446_v26 = vadd.f32 %v1445_v22, %v1444_v13  ;;  %v1270_v29 = vsub.f32 %v1221_v20, %v1262_v62 }
 0x215   : > { %v1429_v3 = vmul.f32 %v2497_v7, %v1428_v18 }
 0x216   : > { %v1452_v25 = vrot.slane %v1451_v53, 2  ;;  %v1447_v61 = vrot.slane %v1446_v26, 1  ;;  %v1278_v40 = vmax.f32 %v1270_v29, 0.0001 }
 0x217   : > { %v1433_v52 = vsel %vm1432_vm9, %v2497_v7, %v1429_v3 }
 0x218   : > { %v1244_v28 = vpop.f32.mrf.mxu3  ;;  %v1453_v30 = vadd.f32 %v1452_v25, %v1451_v53  ;;  %v1448_v44 = vadd.f32 %v1447_v61, %v1446_v26  ;;  %v1438_v51 = vmul.f32 %v1403_v46, %v1278_v40 }
 0x219   : > { %v1271_v14 = vsub.f32 %v1244_v28, %v1263_v31 }
 0x21a   : > { %v1454_v60 = vrot.slane %v1453_v30, 1 }
 0x21b   : > { %v1224_v37 = vpop.f32.mrf.mxu2  ;;  %v1279_v6 = vmax.f32 %v1271_v14, 0.0001 }
 0x21c   : > { %v1455_v39 = vadd.f32 %v1454_v60, %v1453_v30  ;;  %v1272_v41 = vsub.f32 %v1224_v37, %v1264_v35 }
 0x21d   : > { %v1439_v56 = vmul.f32 %v1413_v36, %v1279_v6 }
 0x21e   : > { %v1474_v42 = vrot.slane %v1455_v39, 6  ;;  %v1280_v43 = vmax.f32 %v1272_v41, 0.0001 }
 0x220   : > { %v1247_v49 = vpop.f32.mrf.mxu3  ;;  %v1440_v10 = vmul.f32 %v1423_v48, %v1280_v43  ;;  %v1477_v8 = vsel %vm1476_vm2, %v1448_v44, %v1474_v42 }
 0x221   : > { %v1273_v9 = vsub.f32 %v1247_v49, %v1265_v0 }
 0x222   : > { %v1456_v32 = vadd.f32 %v1440_v10, %v1438_v51 }
 0x223   : > { %v1281_v11 = vmax.f32 %v1273_v9, 0.0001 }
 0x224   : > { %v1457_v47 = vrot.slane %v1456_v32, 4 }
 0x225   : > { %v1441_v34 = vmul.f32 %v1433_v52, %v1281_v11 }
 0x226   : > { %v1458_v2 = vadd.f32 %v1457_v47, %v1456_v32 }
 0x227   : > { %v1463_v24 = vadd.f32 %v1441_v34, %v1439_v56 }
 0x228   : > { %v1459_v12 = vrot.slane %v1458_v2, 2 }
 0x229   : > { %v1464_v50 = vrot.slane %v1463_v24, 4 }
 0x22a   : > { %v1460_v21 = vadd.f32 %v1459_v12, %v1458_v2 }
 0x22b   : > { %v1465_v13 = vadd.f32 %v1464_v50, %v1463_v24 }
 0x22c   : > { %v1461_v16 = vrot.slane %v1460_v21, 1 }
 0x22d   : > { %v1466_v19 = vrot.slane %v1465_v13, 2 }
 0x22e   : > { %v1462_v20 = vadd.f32 %v1461_v16, %v1460_v21 }
 0x22f   : > { %v1467_v54 = vadd.f32 %v1466_v19, %v1465_v13 }
 0x231   : > { %v1468_v15 = vrot.slane %v1467_v54, 1 }
 0x233   : > { %v1469_v17 = vadd.f32 %v1468_v15, %v1467_v54 }
 0x235   : > { %v1475_v63 = vrot.slane %v1469_v17, 6 }
 0x237   : > { %v1478_v7 = vsel %vm1476_vm2, %v1462_v20, %v1475_v63 }
 0x238   : > { %v1483_v22 = vrot.slane %v1478_v7, 7 }
 0x23a   : > { %v1485_v23 = vsel %vm1484_vm10, %v1483_v22, %v1477_v8 }
 0x23b   : > { %v1487_v53 = vsel %vm1486_vm11, %v1483_v22, %v1485_v23 }
 0x23c   : > { %v1489_v58 = vsel %vm1488_vm12, %v1483_v22, %v1487_v53 }
 0x23d   : > { %v1491_v55 = vsel %vm1490_vm13, %v1483_v22, %v1489_v58 }
 0x23e   : > { %1493 = vst [vmem:[%s294_s29] sm:$0xf] %v1491_v55 }
 0x23f   : > { %1931 = shalt.err (!%p1928_p11)
}
 0x240   : > { %1704 = dma.vmem_to_hbm [thread:$0]  (%p2087_p5), %s1509_s30, 64, %s1511_s11, %s1495_s19  }
 0x241 PF: > { %s1522_s25 = sand.u32 1, %s1970_s15   ;;  %p2597_p12 = scmp.ge.s32.totalorder %s1982_s18, 2 }
 0x242   : > { %s1523_s8 = scalar_lea.sflag [#allocation4], %s1522_s25 }
 0x243   : > { %p1721_p13 = pnand %p2597_p12, %p2050_p6 }
 0x245   : > { %p1722_p0 = pneg %p1721_p13 }
 0x247   : > { %1965 = dma.done.wait (%p1722_p0), %s1523_s8, 64  }
 0x248   : > { %1967 = vsyncadd (%p1722_p0), %s1523_s8, 4294967232  ;;  %p21_p3 = scmp.ge.s32.totalorder %s2074_s12, 4   ;;  %s2598_s15 = smov %s1974_s16 }
 0x249   : > { %s2599_s16 = smov %s1978_s17  ;;  %s2600_s17 = smov %s2083_s20 }
 0x24a   : > { %s2601_s18 = smov %s2074_s12  ;;  %23 = sbr.rel (!%p21_p3) target bundleno = 12 (0xc), region = 102 }
 0x24f   :  { %1529 = vsyncpa [#allocation3], 1 }
 0x250   :  { %1531 = vsyncpa [#allocation3 + $0x1], 1 }
 0x251   :  { %1532 = vsyncpa [#allocation6], 1 }
 0x252   :  { %1534 = vsyncpa [#allocation6 + $0x1], 1 }
 0x253   :  { %1535 = vsyncpa [#allocation9], 1 }
 0x254   :  { %1536 = vsyncpa [#allocation4], 1 }
 0x255   :  { %1538 = vsyncpa [#allocation4 + $0x1], 1 }

</bundles_post_ra>
